<compile_context>
chip_gen: v5e
topology: v5e:2x2
jax: 0.10.0
libtpu: 0.0.40
codegen_flags: <defaults>
</compile_context>

<pallas_src>
from functools import partial

import jax
import jax.numpy as jnp
from jax.experimental import pallas as pl
from jax.experimental.pallas import tpu as pltpu

_OUT_W = 128  # lane-dense packed-output width (one full vreg lane row)


def _round_up(n, m):
    return ((n + m - 1) // m) * m


def add_edge_kernel(x_ref, w_ref, out_ref, *, act_col):
    # x_ref: [bm, W] fused slab: [graph_embed | src_embed | action | 1.0 | 0s]
    # w_ref: [1, W]  fused row : [weight                 |   0    | bias | 0s]
    x = x_ref[...]
    w = w_ref[...]

    # Fused concat + Linear(D -> 1) + bias as one VPU mul + one XLU lane-reduce.
    # The action lane contributes 0 (its weight lane is 0); the constant-1 lane
    # contributes the bias.
    logit = jnp.sum(x * w, axis=-1, keepdims=True)          # [bm, 1]

    a = x[:, act_col:act_col + 1]                            # [bm, 1] in {0., 1.}

    # Shared-transcendental logsigmoid (single EUP exp/log1p chain):
    #   logsigmoid(z)  = min(z, 0) - log1p(exp(-|z|))
    #   logsigmoid(-z) = -max(z, 0) - log1p(exp(-|z|))
    t = jnp.log1p(jnp.exp(-jnp.abs(logit)))
    lp = jnp.minimum(logit, 0.0) - t                         # logsigmoid(logit)
    lneg = -jnp.maximum(logit, 0.0) - t                      # logsigmoid(-logit)

    # bernoulli_action_log_prob gather, as pure arithmetic (no int compare).
    samp = lneg + a * (lp - lneg)

    # Pack the three [bm, 1] results into one lane-dense [bm, 128] slab so the
    # kernel issues a single unmasked store + one writeback DMA.
    bm = out_ref.shape[0]
    col = jax.lax.broadcasted_iota(jnp.int32, (bm, _OUT_W), 1)
    packed = jnp.where(col == 0, logit,
             jnp.where(col == 1, lp,
             jnp.where(col == 2, samp, 0.0)))
    out_ref[...] = packed


def add_edge_forward(graph_embed, src_embed, weight, bias, actions, *, block_rows=512):
    """graph_embed: [B, G], src_embed: [B, H], weight: [G+H, 1] (or [1, G+H]),
    bias: [1], actions: [B] int/float (0/1).
    Returns (batch_logit, batch_log_prob, sample_log_prob), each [B, 1] fp32."""
    B, G = graph_embed.shape
    _, H = src_embed.shape
    D = G + H
    W = max(128, _round_up(D + 2, 128))      # fused-slab lane width
    act_col = D                              # action lane
    one_col = D + 1                          # constant-1 lane (carries the bias)

    # Row tiling: multiples of 8 sublanes; small batches get a single tile.
    bm = min(_round_up(block_rows, 8), _round_up(B, 8))
    B_pad = _round_up(B, bm)

    f32 = jnp.float32
    a_col = actions.reshape(B, 1).astype(f32)
    ones = jnp.ones((B, 1), f32)
    x = jnp.concatenate(
        [graph_embed.astype(f32), src_embed.astype(f32), a_col, ones], axis=1)
    x = jnp.pad(x, ((0, B_pad - B), (0, W - (D + 2))))       # [B_pad, W]

    w_row = jnp.concatenate(
        [weight.reshape(1, D).astype(f32),
         jnp.zeros((1, 1), f32),                              # action lane -> 0
         bias.reshape(1, 1).astype(f32),                      # constant-1 lane -> bias
         jnp.zeros((1, W - (D + 2)), f32)], axis=1)           # [1, W]

    grid = (pl.cdiv(B_pad, bm),)
    packed = pl.pallas_call(
        partial(add_edge_kernel, act_col=act_col),
        out_shape=jax.ShapeDtypeStruct((B_pad, _OUT_W), jnp.float32),
        grid=grid,
        in_specs=[pl.BlockSpec((bm, W), lambda i: (i, 0)),
                  pl.BlockSpec((1, W), lambda i: (0, 0))],
        out_specs=pl.BlockSpec((bm, _OUT_W), lambda i: (i, 0)),
        compiler_params=pltpu.CompilerParams(
            dimension_semantics=("parallel",)),
    )(x, w_row)

    logit = packed[:B, 0:1]
    log_prob = packed[:B, 1:2]
    sample_log_prob = packed[:B, 2:3]
    return logit, log_prob, sample_log_prob


def _reference(graph_embed, src_embed, weight, bias, actions):
    x = jnp.concatenate([graph_embed, src_embed], axis=1)
    logit = x @ weight.reshape(-1, 1) + bias
    logp = jax.nn.log_sigmoid(logit)
    samp = jnp.where(actions.reshape(-1, 1) == 1,
                     jax.nn.log_sigmoid(logit),
                     jax.nn.log_sigmoid(-logit))
    return logit, logp, samp


if __name__ == "__main__":
    # Small shapes consistent with DGMG: node_hidden=32, graph_hidden=2*node_hidden=64.
    node_hidden_size = 32
    graph_hidden_size = 2 * node_hidden_size
    B = 8
    D = graph_hidden_size + node_hidden_size

    key = jax.random.PRNGKey(0)
    k1, k2, k3, k4, k5 = jax.random.split(key, 5)
    batch_graph_embed = jax.random.normal(k1, (B, graph_hidden_size), jnp.float32)
    batch_src_embed = jax.random.normal(k2, (B, node_hidden_size), jnp.float32)
    # nn.Linear(D, 1) parameters, deterministic init
    weight = jax.random.uniform(k3, (D, 1), jnp.float32, -1.0, 1.0) / jnp.sqrt(D)
    bias = jax.random.uniform(k4, (1,), jnp.float32, -1.0, 1.0) / jnp.sqrt(D)
    actions = jax.random.bernoulli(k5, 0.5, (B,)).astype(jnp.int32)

    logit, log_prob, sample_log_prob = add_edge_forward(
        batch_graph_embed, batch_src_embed, weight, bias, actions)
    jax.block_until_ready((logit, log_prob, sample_log_prob))

    r_logit, r_logp, r_samp = _reference(
        batch_graph_embed, batch_src_embed, weight, bias, actions)
    assert jnp.allclose(logit, r_logit, atol=1e-5)
    assert jnp.allclose(log_prob, r_logp, atol=1e-5)
    assert jnp.allclose(sample_log_prob, r_samp, atol=1e-5)

    # g_to_add_edge (host-side bookkeeping, mirrors the python loop in forward)
    g_to_add_edge = [i for i, act in enumerate(actions.tolist()) if act == 1]
    del g_to_add_edge

    print("KERNEL_OK")
</pallas_src>

<mosaic_0001>
module attributes {stable_mosaic.version = 11 : i64} {
  func.func @add_edge_kernel(%arg0: i32, %arg1: memref<8x128xf32, #tpu.memory_space<vmem>>, %arg2: memref<1x128xf32, #tpu.memory_space<vmem>>, %arg3: memref<8x128xf32, #tpu.memory_space<vmem>>) attributes {dimension_semantics = [#tpu.dimension_semantics<parallel>], iteration_bounds = array<i64: 1>, scalar_prefetch = 0 : i64, scratch_operands = 0 : i64, tpu.core_type = #tpu.core_type<tc>, window_params = [{transform_indices = @transform_0, window_bounds = array<i64: 8, 128>}, {pipeline_mode = #tpu.pipeline_mode<synchronous>, transform_indices = @transform_1, window_bounds = array<i64: 1, 128>}, {transform_indices = @transform_2, window_bounds = array<i64: 8, 128>}]} {
    %c0 = arith.constant 0 : index
    %c0_0 = arith.constant 0 : index
    %0 = vector.load %arg1[%c0, %c0_0] : memref<8x128xf32, #tpu.memory_space<vmem>>, vector<8x128xf32>
    %c0_1 = arith.constant 0 : index
    %c0_2 = arith.constant 0 : index
    %1 = vector.load %arg2[%c0_1, %c0_2] : memref<1x128xf32, #tpu.memory_space<vmem>>, vector<1x128xf32>
    %2 = vector.broadcast %1 : vector<1x128xf32> to vector<8x128xf32>
    %3 = arith.mulf %0, %2 : vector<8x128xf32>
    %cst = arith.constant dense<0.000000e+00> : vector<8xf32>
    %4 = vector.multi_reduction <add>, %3, %cst [1] : vector<8x128xf32> to vector<8xf32>
    %5 = vector.shape_cast %4 : vector<8xf32> to vector<8x1xf32>
    %6 = vector.extract_strided_slice %0 {offsets = [0, 96], sizes = [8, 1], strides = [1, 1]} : vector<8x128xf32> to vector<8x1xf32>
    %7 = math.absf %5 : vector<8x1xf32>
    %cst_3 = arith.constant 0.000000e+00 : f32
    %8 = vector.broadcast %cst_3 : f32 to vector<8x1xf32>
    %9 = arith.subf %8, %7 : vector<8x1xf32>
    %10 = math.exp %9 : vector<8x1xf32>
    %11 = math.log1p %10 : vector<8x1xf32>
    %cst_4 = arith.constant 0.000000e+00 : f32
    %12 = vector.broadcast %cst_4 : f32 to vector<8x1xf32>
    %13 = arith.minimumf %5, %12 : vector<8x1xf32>
    %14 = arith.subf %13, %11 : vector<8x1xf32>
    %cst_5 = arith.constant 0.000000e+00 : f32
    %15 = vector.broadcast %cst_5 : f32 to vector<8x1xf32>
    %16 = arith.maximumf %5, %15 : vector<8x1xf32>
    %cst_6 = arith.constant 0.000000e+00 : f32
    %17 = vector.broadcast %cst_6 : f32 to vector<8x1xf32>
    %18 = arith.subf %17, %16 : vector<8x1xf32>
    %19 = arith.subf %18, %11 : vector<8x1xf32>
    %20 = arith.subf %14, %19 : vector<8x1xf32>
    %21 = arith.mulf %6, %20 : vector<8x1xf32>
    %22 = arith.addf %19, %21 : vector<8x1xf32>
    %23 = tpu.iota {dimensions = array<i32: 1>} : vector<8x128xi32>
    %c0_i32 = arith.constant 0 : i32
    %24 = vector.broadcast %c0_i32 : i32 to vector<8x128xi32>
    %25 = arith.cmpi eq, %23, %24 : vector<8x128xi32>
    %c1_i32 = arith.constant 1 : i32
    %26 = vector.broadcast %c1_i32 : i32 to vector<8x128xi32>
    %27 = arith.cmpi eq, %23, %26 : vector<8x128xi32>
    %c2_i32 = arith.constant 2 : i32
    %28 = vector.broadcast %c2_i32 : i32 to vector<8x128xi32>
    %29 = arith.cmpi eq, %23, %28 : vector<8x128xi32>
    %cst_7 = arith.constant 0.000000e+00 : f32
    %30 = vector.shape_cast %22 : vector<8x1xf32> to vector<8x1xf32>
    %31 = vector.broadcast %30 : vector<8x1xf32> to vector<8x128xf32>
    %32 = vector.broadcast %cst_7 : f32 to vector<8x128xf32>
    %33 = arith.select %29, %31, %32 : vector<8x128xi1>, vector<8x128xf32>
    %34 = vector.shape_cast %14 : vector<8x1xf32> to vector<8x1xf32>
    %35 = vector.broadcast %34 : vector<8x1xf32> to vector<8x128xf32>
    %36 = arith.select %27, %35, %33 : vector<8x128xi1>, vector<8x128xf32>
    %37 = vector.shape_cast %5 : vector<8x1xf32> to vector<8x1xf32>
    %38 = vector.broadcast %37 : vector<8x1xf32> to vector<8x128xf32>
    %39 = arith.select %25, %38, %36 : vector<8x128xi1>, vector<8x128xf32>
    %c0_8 = arith.constant 0 : index
    %c0_9 = arith.constant 0 : index
    %40 = vector.load %arg3[%c0_8, %c0_9] : memref<8x128xf32, #tpu.memory_space<vmem>>, vector<8x128xf32>
    tpu.vector_store %arg3[%c0_8, %c0_9], %39 {strides = array<i32>} : memref<8x128xf32, #tpu.memory_space<vmem>>, vector<8x128xf32>,
    return
  }
  func.func @transform_0(%arg0: i32) -> (i32, i32) {
    %c0_i32 = arith.constant 0 : i32
    %c0_i32_0 = arith.constant 0 : i32
    return %arg0, %c0_i32 : i32, i32
  }
  func.func @transform_1(%arg0: i32) -> (i32, i32) {
    %c0_i32 = arith.constant 0 : i32
    %c0_i32_0 = arith.constant 0 : i32
    %c0_i32_1 = arith.constant 0 : i32
    return %c0_i32, %c0_i32_0 : i32, i32
  }
  func.func @transform_2(%arg0: i32) -> (i32, i32) {
    %c0_i32 = arith.constant 0 : i32
    %c0_i32_0 = arith.constant 0 : i32
    return %arg0, %c0_i32 : i32, i32
  }
}

</mosaic_0001>

<bundles_post_ra>
// kernel: tpu_custom_call.1
= control target key start
LH: loop header
LB: loop body
LE: loop exit
PB: predicated region body
PF: predicated region fallthrough
CT: control target
= control target key end

     0   :  { %7 = vsyncpa [#allocation3], 0  ;;  %s217_s0 = inlined_call_operand.hbm [shape: f32[8,128], index: 0, kind: input, shape index: {}]   ;;  %s218_s1 = inlined_call_operand.hbm [shape: f32[1,128], index: 1, kind: input, shape index: {}]   ;;  %s219_s2 = inlined_call_operand.hbm [shape: f32[8,128], index: 2, kind: output, shape index: {}]  }
   0x1   :  { %8 = vsyncpa [#allocation6], 0 }
   0x2   :  { %9 = vsyncpa [#allocation4], 0  ;;  %s15_s11 = sshll.u32 %s217_s0, 4  ;;  %s189_s12 = smov [#allocation2]   ;;  %s16_s11 = int_to_ptr.hbm [resolvable:$true] %s15_s11 }
   0x3   :  { %s17_s13 = sshll.u32 %s189_s12, 4  ;;  %s26_s16 = sshll.u32 %s218_s1, 4  ;;  %s18_s13 = int_to_ptr.vmem [resolvable:$true] %s17_s13  ;;  %s27_s16 = int_to_ptr.hbm [resolvable:$true] %s26_s16 }
   0x4   :  { %20 = dma.hbm_to_vmem [thread:$0]  %s16_s11, 128, %s18_s13, [#allocation3]  }
   0x5   :  { %s190_s17 = smov [#allocation5]  }
   0x6   :  { %s28_s18 = sshll.u32 %s190_s17, 4  ;;  %s29_s18 = int_to_ptr.vmem [resolvable:$true] %s28_s18 }
   0x7   :  { %31 = dma.hbm_to_vmem [thread:$0]  %s27_s16, 16, %s29_s18, [#allocation6]  }
   0x8   :  { %183 = dma.done.wait [#allocation3], 128  }
   0x9   :  { %184 = vsyncadd [#allocation3], 4294967168 }
   0xa   :  { %185 = dma.done.wait [#allocation6], 16  }
   0xb   :  { %186 = vsyncadd [#allocation6], 4294967280  ;;  %v40_v0 = vld [vmem:[#allocation2] sm:$0xff]  ;;  %v106_v1 = vld [vmem:[#allocation5] ss:$0 sm:$0xff]  ;;  %v191_v3 = vmov 96   ;;  %v69_v25 = vlaneseq }
   0xc   :  { %v45_v2 = vmul.f32 %v106_v1, %v40_v0  ;;  %105 = vset.pattern.permute.xlu0 %v191_v3  ;;  %s192_s0 = smov [#allocation7]   ;;  %s90_s21 = sshll.u32 %s219_s2, 4  ;;  %s91_s21 = int_to_ptr.hbm [resolvable:$true] %s90_s21 }
   0xd   :  { %v70_v26 = vand.u32 127, %v69_v25  ;;  %s88_s1 = sshll.u32 %s192_s0, 4  ;;  %s89_s1 = int_to_ptr.vmem [resolvable:$true] %s88_s1 }
   0xe   :  { %46 = vadd.xlane.f32.xlu0 %v45_v2 }
   0xf   :  { %vm73_vm1 = vcmp.eq.s32.totalorder %v70_v26, 2  ;;  %vm72_vm2 = vcmp.eq.s32.totalorder %v70_v26, 1  ;;  %vm71_vm3 = vcmp.eq.s32.totalorder %v70_v26, 0 }
  0x81   :  { %v47_v4 = vpop.xlane.xlu0 %46 }
  0x82   :  { %v48_v5 = vand.u32 2147483647, %v47_v4  ;;  %v63_v12 = vmax.f32 %v47_v4, 0.0  ;;  %v61_v17 = vmin.f32 %v47_v4, 0.0 }
  0x84   :  { %v49_v6 = vsub.f32 0.0, %v48_v5  ;;  %v64_v18 = vsub.f32 0.0, %v63_v12 }
  0x86   :  { %v50_v7 = vmul.f32 1.442695, %v49_v6 }
  0x88   :  { %107 = vpow2.f32 %v50_v7 }
  0x8e   :  { %v108_v8 = vpop.eup %107 }
  0x8f   :  { %v52_v9 = vadd.f32 1.0, %v108_v8  ;;  %v55_v10 = vmul.f32 -0.5, %v108_v8  ;;  %v58_v13 = vand.u32 2147483647, %v108_v8 }
  0x91   :  { %109 = vlog2.f32 %v52_v9  ;;  %v56_v11 = vadd.f32 1.0, %v55_v10  ;;  %vm59_vm0 = vcmp.lt.f32.partialorder %v58_v13, 0.0004427343 }
  0x93   :  { %v57_v16 = vmul.f32 %v108_v8, %v56_v11 }
  0x97   :  { %v110_v14 = vpop.eup %109 }
  0x98   :  { %v54_v15 = vmul.f32 0.6931472, %v110_v14 }
  0x9a   :  { %v60_v19 = vsel %vm59_vm0, %v57_v16, %v54_v15 }
  0x9b   :  { %v62_v20 = vsub.f32 %v61_v17, %v60_v19  ;;  %v65_v21 = vsub.f32 %v64_v18, %v60_v19 }
  0x9d   :  { %v66_v22 = vsub.f32 %v62_v20, %v65_v21 }
  0x9f   :  { %v67_v23 = vmul.f32 %v66_v22, %v40_v0 }
  0xa1   :  { %v68_v24 = vadd.f32 %v67_v23, %v65_v21 }
  0xa3   :  { %76 = vperm.xlu0 %105, %v68_v24  }
 0x115   :  { %v77_v27 = vpop.permute.xlu0 %76 }
 0x116   :  { %v79_v28 = vsel %vm73_vm1, %v77_v27, 0.0 }
 0x117   :  { %v80_v29 = vsel %vm72_vm2, %v62_v20, %v79_v28 }
 0x118   :  { %v81_v30 = vsel %vm71_vm3, %v47_v4, %v80_v29 }
 0x119   :  { %82 = vst [vmem:[#allocation7] sm:$0xff] %v81_v30 }
 0x11a   :  { %93 = dma.vmem_to_hbm [thread:$0]  %s89_s1, 128, %s91_s21, [#allocation4]  }
 0x11b   :  { %187 = dma.done.wait [#allocation4], 128  }
 0x11c   :  { %188 = vsyncadd [#allocation4], 4294967168 }
 0x11d   :  { %98 = vsyncpa [#allocation3], 1 }
 0x11e   :  { %99 = vsyncpa [#allocation6], 1 }
 0x11f   :  { %100 = vsyncpa [#allocation4], 1 }

</bundles_post_ra>
